<compile_context>
chip_gen: v7x
topology: tpu7x:2x2x1
jax: 0.10.0
libtpu: 0.0.40
codegen_flags: <defaults>
</compile_context>

<pallas_src>
import functools

import jax
import jax.numpy as jnp
from jax.experimental import pallas as pl
from jax.experimental.pallas import tpu as pltpu

_LANES = 128
_SUBLANES = 8
_TARGET_TILE_BYTES = 2 * 1024 * 1024   # ~2 MiB per input per grid step


def _ftl_partial_sums_kernel(x_ref, t_ref, out_ref, acc_x, acc_t, acc_xt, *,
                             valid_rows, tile_rows, steps_per_chunk,
                             needs_mask):
    c = pl.program_id(0)   # "parallel" chunk axis (2 TCs on v7x)
    j = pl.program_id(1)   # sequential ("arbitrary") reduction axis

    @pl.when(j == 0)
    def _():
        acc_x[...] = jnp.zeros_like(acc_x)
        acc_t[...] = jnp.zeros_like(acc_t)
        acc_xt[...] = jnp.zeros_like(acc_xt)

    x = x_ref[...].astype(jnp.float32)
    t = t_ref[...].astype(jnp.float32)

    def accumulate(xv, tv):
        # Reduce the (tile_rows, 128) tile over 8-row blocks into one-vreg
        # (8, 128) accumulators: ~4 VALU ops / element, and only 3 accumulator
        # loads + 3 stores per *tile* (not per vreg).
        acc_x[...] += xv.reshape(-1, _SUBLANES, _LANES).sum(axis=0)
        acc_t[...] += tv.reshape(-1, _SUBLANES, _LANES).sum(axis=0)
        acc_xt[...] += (xv * tv).reshape(-1, _SUBLANES, _LANES).sum(axis=0)

    if needs_mask:
        # Only edge blocks (ragged tail / duplicated clamp-reads) take the
        # masked path; steady-state steps stay mask-free.
        base_row = (c * steps_per_chunk + j) * tile_rows   # UNclamped step
        is_edge = base_row + tile_rows > valid_rows

        @pl.when(is_edge)
        def _():
            row_ids = base_row + jax.lax.broadcasted_iota(
                jnp.int32, (tile_rows, _LANES), 0)
            ok = row_ids < valid_rows
            accumulate(jnp.where(ok, x, 0.0), jnp.where(ok, t, 0.0))

        @pl.when(jnp.logical_not(is_edge))
        def _():
            accumulate(x, t)
    else:
        accumulate(x, t)

    @pl.when(j == steps_per_chunk - 1)
    def _():
        out_ref[0, 0] = acc_x[...]
        out_ref[0, 1] = acc_t[...]
        out_ref[0, 2] = acc_xt[...]


def _partial_sums(x2d, t2d, *, tile_rows, num_chunks):
    rows = x2d.shape[0]
    steps_total = pl.cdiv(rows, tile_rows)
    chunks = max(1, min(int(num_chunks), steps_total))
    steps_per_chunk = pl.cdiv(steps_total, chunks)
    clamp_needed = chunks * steps_per_chunk != steps_total
    needs_mask = (rows % tile_rows != 0) or clamp_needed
    last_block = steps_total - 1

    def in_map(c, j):
        step = c * steps_per_chunk + j
        if clamp_needed:
            # Keep both chunks busy for uneven splits: clamp the block index;
            # the kernel zeroes the duplicated read via the unclamped row mask.
            step = jnp.minimum(step, last_block)
        return (step, 0)

    kernel = functools.partial(
        _ftl_partial_sums_kernel,
        valid_rows=rows, tile_rows=tile_rows,
        steps_per_chunk=steps_per_chunk, needs_mask=needs_mask)

    # Explicit scoped-VMEM budget: double-buffered input tiles + in-kernel f32
    # temporaries + margin (keeps the big-tile win portable to v5e's 16 MiB
    # default scoped limit, and stays well under v7x's 64 MiB physical VMEM).
    x_tile = tile_rows * _LANES * x2d.dtype.itemsize
    t_tile = tile_rows * _LANES * t2d.dtype.itemsize
    f32_tile = tile_rows * _LANES * 4
    vmem_need = 2 * (x_tile + t_tile) + 3 * f32_tile
    vmem_limit = int(min(max(vmem_need + (8 << 20), 32 << 20), 48 << 20))

    # TODO(synk): on v7x, if profiling shows one TensorCore idle, switch the
    # chunk axis to pltpu.CORE_PARALLEL (or a core_map split).
    return pl.pallas_call(
        kernel,
        out_shape=jax.ShapeDtypeStruct((chunks, 3, _SUBLANES, _LANES),
                                       jnp.float32),
        grid_spec=pltpu.PrefetchScalarGridSpec(
            num_scalar_prefetch=0,
            grid=(chunks, steps_per_chunk),
            in_specs=[
                pl.BlockSpec((tile_rows, _LANES), in_map),
                pl.BlockSpec((tile_rows, _LANES), in_map),
            ],
            out_specs=pl.BlockSpec((1, 3, _SUBLANES, _LANES),
                                   lambda c, j: (c, 0, 0, 0)),
            scratch_shapes=[
                pltpu.VMEM((_SUBLANES, _LANES), jnp.float32),
                pltpu.VMEM((_SUBLANES, _LANES), jnp.float32),
                pltpu.VMEM((_SUBLANES, _LANES), jnp.float32),
            ],
        ),
        compiler_params=pltpu.CompilerParams(
            dimension_semantics=("parallel", "arbitrary"),
            vmem_limit_bytes=vmem_limit),
    )(x2d, t2d)


def _tversky_from_sums(sum_x, sum_t, tp, alpha, beta, gamma, smooth):
    fp = sum_x - tp                       # sum((1 - t) * x)
    fn = sum_t - tp                       # sum(t * (1 - x))
    tversky = (tp + smooth) / (tp + alpha * fp + beta * fn + smooth)
    return (1.0 - tversky) ** gamma


def _streamable(a):
    """Pick a cheap-to-stream dtype (no 4x promotion of bool/int masks)."""
    if a.dtype == jnp.bool_:
        return a.astype(jnp.int8)         # 1 byte/elem; cast to f32 in-kernel
    if jnp.issubdtype(a.dtype, jnp.floating):
        if a.dtype.itemsize > 4:
            return a.astype(jnp.float32)
        return a                          # f32 / bf16 / f16 stream natively
    if a.dtype in (jnp.int8, jnp.uint8, jnp.int32):
        return a                          # cast to f32 in-kernel
    return a.astype(jnp.float32)


def _default_num_chunks():
    # v7x (2 TensorCores/chip) benefits from splitting the stream in two; on
    # single-TC v5e/v6e an extra chunk only adds epilogue work.
    try:
        return 2 if int(getattr(jax.devices()[0], "num_cores", 1)) >= 2 else 1
    except Exception:
        return 1


def focal_tversky_loss(inputs, targets, *, alpha=0.2, beta=0.8, gamma=2,
                       smooth=1e-6, tile_rows=None, num_chunks=None):
    """Pallas implementation of FocalTverskyLoss.forward (returns a scalar)."""
    x = _streamable(inputs.reshape(-1))
    t = _streamable(targets.reshape(-1))
    n = x.shape[0]

    if n < _SUBLANES * _LANES:
        # Too small to be worth a kernel launch: plain-JAX fallback.
        xf = x.astype(jnp.float32)
        tf = t.astype(jnp.float32)
        return _tversky_from_sums(jnp.sum(xf), jnp.sum(tf), jnp.sum(xf * tf),
                                  alpha, beta, gamma, smooth)

    rem = n % _LANES
    if rem:
        # Rare unaligned case: zero-pad to a multiple of 128 lanes (zeros are
        # exact for all three sums).  Aligned inputs reshape with zero copies.
        pad = _LANES - rem
        x = jnp.pad(x, (0, pad))
        t = jnp.pad(t, (0, pad))
    rows = x.shape[0] // _LANES
    x2 = x.reshape(rows, _LANES)
    t2 = t.reshape(rows, _LANES)

    if tile_rows is None:
        # ~2 MiB per input per step: 4096 rows for f32, 8192 for bf16/int8.
        itemsize = max(x2.dtype.itemsize, t2.dtype.itemsize)
        tile_rows = _TARGET_TILE_BYTES // (_LANES * itemsize)
    tile_rows = min(int(tile_rows), (rows // _SUBLANES) * _SUBLANES)
    tile_rows = max(_SUBLANES, (tile_rows // _SUBLANES) * _SUBLANES)

    if num_chunks is None:
        num_chunks = _default_num_chunks()

    partials = _partial_sums(x2, t2, tile_rows=tile_rows,
                             num_chunks=num_chunks)
    sums = jnp.sum(partials, axis=(0, 2, 3))    # (3,) = [sum_x, sum_t, tp]
    return _tversky_from_sums(sums[0], sums[1], sums[2],
                              alpha, beta, gamma, smooth)


def focal_tversky_loss_ref(inputs, targets, alpha=0.2, beta=0.8, gamma=2,
                           smooth=1e-6):
    """Pure-JAX reference matching the PyTorch module."""
    x = inputs.reshape(-1).astype(jnp.float32)
    t = targets.reshape(-1).astype(jnp.float32)
    tp = jnp.sum(x * t)
    fp = jnp.sum((1.0 - t) * x)
    fn = jnp.sum(t * (1.0 - x))
    tversky = (tp + smooth) / (tp + alpha * fp + beta * fn + smooth)
    return (1.0 - tversky) ** gamma


if __name__ == "__main__":
    key = jax.random.PRNGKey(0)
    k1, k2, k3, k4, k5 = jax.random.split(key, 5)

    # 1) Aligned single-block case (NCHW segmentation probs vs. 0/1 mask).
    x1 = jax.nn.sigmoid(jax.random.normal(k1, (2, 4, 16, 16), jnp.float32))
    t1 = (jax.random.uniform(k2, (2, 4, 16, 16)) > 0.5).astype(jnp.float32)
    out1 = jax.block_until_ready(focal_tversky_loss(x1, t1))
    ref1 = focal_tversky_loss_ref(x1, t1)
    assert jnp.allclose(out1, ref1, rtol=1e-5, atol=1e-6), (out1, ref1)

    # 2) Ragged rows + uneven 2-chunk split (exercises clamp + edge-row mask).
    x2 = jax.nn.sigmoid(jax.random.normal(k3, (2, 4, 40, 40), jnp.float32))
    t2 = (jax.random.uniform(k4, (2, 4, 40, 40)) > 0.5).astype(jnp.float32)
    out2 = jax.block_until_ready(
        focal_tversky_loss(x2, t2, tile_rows=40, num_chunks=2))
    ref2 = focal_tversky_loss_ref(x2, t2)
    assert jnp.allclose(out2, ref2, rtol=1e-5, atol=1e-6), (out2, ref2)

    # 3) Boolean targets streamed natively as int8.
    x3 = jax.nn.sigmoid(jax.random.normal(k5, (1, 1, 32, 32), jnp.float32))
    t3 = jax.random.uniform(k2, (1, 1, 32, 32)) > 0.5
    out3 = jax.block_until_ready(focal_tversky_loss(x3, t3))
    ref3 = focal_tversky_loss_ref(x3, t3)
    assert jnp.allclose(out3, ref3, rtol=1e-5, atol=1e-6), (out3, ref3)

    print("KERNEL_OK")
</pallas_src>

<mosaic_0001>
module attributes {stable_mosaic.version = 11 : i64} {
  func.func @_ftl_partial_sums_kernel(%arg0: i32, %arg1: i32, %arg2: memref<16x128xf32, #tpu.memory_space<vmem>>, %arg3: memref<16x128xf32, #tpu.memory_space<vmem>>, %arg4: memref<1x3x8x128xf32, #tpu.memory_space<vmem>>, %arg5: memref<8x128xf32, #tpu.memory_space<vmem>>, %arg6: memref<8x128xf32, #tpu.memory_space<vmem>>, %arg7: memref<8x128xf32, #tpu.memory_space<vmem>>) attributes {dimension_semantics = [#tpu.dimension_semantics<parallel>, #tpu.dimension_semantics<arbitrary>], iteration_bounds = array<i64: 1, 1>, scalar_prefetch = 0 : i64, scratch_operands = 3 : i64, tpu.core_type = #tpu.core_type<tc>, window_params = [{transform_indices = @transform_0, window_bounds = array<i64: 16, 128>}, {transform_indices = @transform_1, window_bounds = array<i64: 16, 128>}, {transform_indices = @transform_2, window_bounds = array<i64: 1, 3, 8, 128>}]} {
    %c0_i32 = arith.constant 0 : i32
    %0 = arith.cmpi eq, %arg1, %c0_i32 : i32
    %1 = arith.extui %0 : i1 to i32
    %c0_i32_0 = arith.constant 0 : i32
    %2 = arith.cmpi ne, %1, %c0_i32_0 : i32
    scf.if %2 {
      %cst_20 = arith.constant 0.000000e+00 : f32
      %24 = vector.broadcast %cst_20 : f32 to vector<8x128xf32>
      %c0_21 = arith.constant 0 : index
      %c0_22 = arith.constant 0 : index
      %25 = vector.load %arg5[%c0_21, %c0_22] : memref<8x128xf32, #tpu.memory_space<vmem>>, vector<8x128xf32>
      tpu.vector_store %arg5[%c0_21, %c0_22], %24 {strides = array<i32>} : memref<8x128xf32, #tpu.memory_space<vmem>>, vector<8x128xf32>,
      %cst_23 = arith.constant 0.000000e+00 : f32
      %26 = vector.broadcast %cst_23 : f32 to vector<8x128xf32>
      %c0_24 = arith.constant 0 : index
      %c0_25 = arith.constant 0 : index
      %27 = vector.load %arg6[%c0_24, %c0_25] : memref<8x128xf32, #tpu.memory_space<vmem>>, vector<8x128xf32>
      tpu.vector_store %arg6[%c0_24, %c0_25], %26 {strides = array<i32>} : memref<8x128xf32, #tpu.memory_space<vmem>>, vector<8x128xf32>,
      %cst_26 = arith.constant 0.000000e+00 : f32
      %28 = vector.broadcast %cst_26 : f32 to vector<8x128xf32>
      %c0_27 = arith.constant 0 : index
      %c0_28 = arith.constant 0 : index
      %29 = vector.load %arg7[%c0_27, %c0_28] : memref<8x128xf32, #tpu.memory_space<vmem>>, vector<8x128xf32>
      tpu.vector_store %arg7[%c0_27, %c0_28], %28 {strides = array<i32>} : memref<8x128xf32, #tpu.memory_space<vmem>>, vector<8x128xf32>,
    } else {
    }
    %c0 = arith.constant 0 : index
    %c0_1 = arith.constant 0 : index
    %3 = vector.load %arg2[%c0, %c0_1] : memref<16x128xf32, #tpu.memory_space<vmem>>, vector<16x128xf32>
    %c0_2 = arith.constant 0 : index
    %c0_3 = arith.constant 0 : index
    %4 = vector.load %arg3[%c0_2, %c0_3] : memref<16x128xf32, #tpu.memory_space<vmem>>, vector<16x128xf32>
    %c0_4 = arith.constant 0 : index
    %c0_5 = arith.constant 0 : index
    %5 = vector.load %arg5[%c0_4, %c0_5] : memref<8x128xf32, #tpu.memory_space<vmem>>, vector<8x128xf32>
    %6 = vector.shape_cast %3 : vector<16x128xf32> to vector<2x8x128xf32>
    %cst = arith.constant dense<0.000000e+00> : vector<8x128xf32>
    %7 = vector.multi_reduction <add>, %6, %cst [0] : vector<2x8x128xf32> to vector<8x128xf32>
    %8 = arith.addf %5, %7 : vector<8x128xf32>
    %c0_6 = arith.constant 0 : index
    %c0_7 = arith.constant 0 : index
    %9 = vector.load %arg5[%c0_6, %c0_7] : memref<8x128xf32, #tpu.memory_space<vmem>>, vector<8x128xf32>
    tpu.vector_store %arg5[%c0_6, %c0_7], %8 {strides = array<i32>} : memref<8x128xf32, #tpu.memory_space<vmem>>, vector<8x128xf32>,
    %c0_8 = arith.constant 0 : index
    %c0_9 = arith.constant 0 : index
    %10 = vector.load %arg6[%c0_8, %c0_9] : memref<8x128xf32, #tpu.memory_space<vmem>>, vector<8x128xf32>
    %11 = vector.shape_cast %4 : vector<16x128xf32> to vector<2x8x128xf32>
    %cst_10 = arith.constant dense<0.000000e+00> : vector<8x128xf32>
    %12 = vector.multi_reduction <add>, %11, %cst_10 [0] : vector<2x8x128xf32> to vector<8x128xf32>
    %13 = arith.addf %10, %12 : vector<8x128xf32>
    %c0_11 = arith.constant 0 : index
    %c0_12 = arith.constant 0 : index
    %14 = vector.load %arg6[%c0_11, %c0_12] : memref<8x128xf32, #tpu.memory_space<vmem>>, vector<8x128xf32>
    tpu.vector_store %arg6[%c0_11, %c0_12], %13 {strides = array<i32>} : memref<8x128xf32, #tpu.memory_space<vmem>>, vector<8x128xf32>,
    %c0_13 = arith.constant 0 : index
    %c0_14 = arith.constant 0 : index
    %15 = vector.load %arg7[%c0_13, %c0_14] : memref<8x128xf32, #tpu.memory_space<vmem>>, vector<8x128xf32>
    %16 = arith.mulf %3, %4 : vector<16x128xf32>
    %17 = vector.shape_cast %16 : vector<16x128xf32> to vector<2x8x128xf32>
    %cst_15 = arith.constant dense<0.000000e+00> : vector<8x128xf32>
    %18 = vector.multi_reduction <add>, %17, %cst_15 [0] : vector<2x8x128xf32> to vector<8x128xf32>
    %19 = arith.addf %15, %18 : vector<8x128xf32>
    %c0_16 = arith.constant 0 : index
    %c0_17 = arith.constant 0 : index
    %20 = vector.load %arg7[%c0_16, %c0_17] : memref<8x128xf32, #tpu.memory_space<vmem>>, vector<8x128xf32>
    tpu.vector_store %arg7[%c0_16, %c0_17], %19 {strides = array<i32>} : memref<8x128xf32, #tpu.memory_space<vmem>>, vector<8x128xf32>,
    %c0_i32_18 = arith.constant 0 : i32
    %21 = arith.cmpi eq, %arg1, %c0_i32_18 : i32
    %22 = arith.extui %21 : i1 to i32
    %c0_i32_19 = arith.constant 0 : i32
    %23 = arith.cmpi ne, %22, %c0_i32_19 : i32
    scf.if %23 {
      %c0_20 = arith.constant 0 : index
      %c0_21 = arith.constant 0 : index
      %24 = vector.load %arg5[%c0_20, %c0_21] : memref<8x128xf32, #tpu.memory_space<vmem>>, vector<8x128xf32>
      %c0_22 = arith.constant 0 : index
      %c0_23 = arith.constant 0 : index
      %c0_24 = arith.constant 0 : index
      %c0_25 = arith.constant 0 : index
      %25 = vector.load %arg4[%c0_22, %c0_23, %c0_24, %c0_25] : memref<1x3x8x128xf32, #tpu.memory_space<vmem>>, vector<1x1x8x128xf32>
      %26 = vector.shape_cast %25 : vector<1x1x8x128xf32> to vector<8x128xf32>
      %27 = vector.shape_cast %24 : vector<8x128xf32> to vector<1x1x8x128xf32>
      tpu.vector_store %arg4[%c0_22, %c0_23, %c0_24, %c0_25], %27 {strides = array<i32>} : memref<1x3x8x128xf32, #tpu.memory_space<vmem>>, vector<1x1x8x128xf32>,
      %c0_26 = arith.constant 0 : index
      %c0_27 = arith.constant 0 : index
      %28 = vector.load %arg6[%c0_26, %c0_27] : memref<8x128xf32, #tpu.memory_space<vmem>>, vector<8x128xf32>
      %c0_28 = arith.constant 0 : index
      %c1 = arith.constant 1 : index
      %c0_29 = arith.constant 0 : index
      %c0_30 = arith.constant 0 : index
      %29 = vector.load %arg4[%c0_28, %c1, %c0_29, %c0_30] : memref<1x3x8x128xf32, #tpu.memory_space<vmem>>, vector<1x1x8x128xf32>
      %30 = vector.shape_cast %29 : vector<1x1x8x128xf32> to vector<8x128xf32>
      %31 = vector.shape_cast %28 : vector<8x128xf32> to vector<1x1x8x128xf32>
      tpu.vector_store %arg4[%c0_28, %c1, %c0_29, %c0_30], %31 {strides = array<i32>} : memref<1x3x8x128xf32, #tpu.memory_space<vmem>>, vector<1x1x8x128xf32>,
      %c0_31 = arith.constant 0 : index
      %c0_32 = arith.constant 0 : index
      %32 = vector.load %arg7[%c0_31, %c0_32] : memref<8x128xf32, #tpu.memory_space<vmem>>, vector<8x128xf32>
      %c0_33 = arith.constant 0 : index
      %c2 = arith.constant 2 : index
      %c0_34 = arith.constant 0 : index
      %c0_35 = arith.constant 0 : index
      %33 = vector.load %arg4[%c0_33, %c2, %c0_34, %c0_35] : memref<1x3x8x128xf32, #tpu.memory_space<vmem>>, vector<1x1x8x128xf32>
      %34 = vector.shape_cast %33 : vector<1x1x8x128xf32> to vector<8x128xf32>
      %35 = vector.shape_cast %32 : vector<8x128xf32> to vector<1x1x8x128xf32>
      tpu.vector_store %arg4[%c0_33, %c2, %c0_34, %c0_35], %35 {strides = array<i32>} : memref<1x3x8x128xf32, #tpu.memory_space<vmem>>, vector<1x1x8x128xf32>,
    } else {
    }
    return
  }
  func.func @transform_0(%arg0: i32, %arg1: i32) -> (i32, i32) {
    %c1_i32 = arith.constant 1 : i32
    %0 = arith.muli %arg0, %c1_i32 : i32
    %1 = arith.addi %0, %arg1 : i32
    %c0_i32 = arith.constant 0 : i32
    %c0_i32_0 = arith.constant 0 : i32
    return %1, %c0_i32 : i32, i32
  }
  func.func @transform_1(%arg0: i32, %arg1: i32) -> (i32, i32) {
    %c1_i32 = arith.constant 1 : i32
    %0 = arith.muli %arg0, %c1_i32 : i32
    %1 = arith.addi %0, %arg1 : i32
    %c0_i32 = arith.constant 0 : i32
    %c0_i32_0 = arith.constant 0 : i32
    return %1, %c0_i32 : i32, i32
  }
  func.func @transform_2(%arg0: i32, %arg1: i32) -> (i32, i32, i32, i32) {
    %c0_i32 = arith.constant 0 : i32
    %c0_i32_0 = arith.constant 0 : i32
    %c0_i32_1 = arith.constant 0 : i32
    %c0_i32_2 = arith.constant 0 : i32
    return %arg0, %c0_i32, %c0_i32_0, %c0_i32_1 : i32, i32, i32, i32
  }
}

</mosaic_0001>

<bundles_post_ra>
// kernel: tpu_custom_call.1
= control target key start
LH: loop header
LB: loop body
LE: loop exit
PB: predicated region body
PF: predicated region fallthrough
CT: control target
= control target key end

     0   :  { %7 = vsyncpa [#allocation6], 0  ;;  %s248_s0 = inlined_call_operand.hbm [shape: f32[16,128], index: 0, kind: input, shape index: {}]   ;;  %s249_s1 = inlined_call_operand.hbm [shape: f32[16,128], index: 1, kind: input, shape index: {}]   ;;  %s250_s2 = inlined_call_operand.hbm [shape: f32[1,3,8,128], index: 2, kind: output, shape index: {}]  }
   0x1   :  { %8 = vsyncpa [#allocation9], 0 }
   0x2   :  { %9 = vsyncpa [#allocation7], 0  ;;  %s183_s9 = smov [#allocation5]   ;;  %s111_s13 = scalar_lea.hbm %s248_s0, 256 }
   0x3   :  { %s19_s10 = sshll.u32 %s183_s9, 4  ;;  %p112_p0 = scmp.ne.s32.totalorder %s248_s0, %s111_s13  ;;  %s20_s10 = int_to_ptr.vmem [resolvable:$true] %s19_s10 }
   0x4   :  { %p115_p1 = scmp.lt.u32.totalorder %s111_s13, %s248_s0 }
   0x6   :  { %p117_p2 = pnand %p115_p1, %p112_p0 }
   0x8   :  { %120 = shalt.err (!%p117_p2)
}
   0x9   :  { %s121_s18 = scalar_lea.vmem %s20_s10, 256  ;;  %p126_p4 = scmp.lt.s32.totalorder %s20_s10, %s20_s10 }
   0xa   :  { %p122_p3 = scmp.ne.s32.totalorder %s20_s10, %s121_s18  ;;  %p127_p5 = scmp.lt.s32.totalorder %s121_s18, %s121_s18 }
   0xc   :  { %p128_p6 = por %p127_p5, %p126_p4 }
   0xe   :  { %p129_p7 = pnand %p128_p6, %p122_p3 }
  0x10   :  { %132 = shalt.err (!%p129_p7)
}
  0x11   :  { %s184_s19 = smov 128   ;;  %s185_s20 = smov 8  }
  0x12   :  { %25 = dma.hbm_to_vmem [thread:$0]  %s248_s0, 256, %s20_s10, [#allocation6], %s184_s19, %s184_s19, %s185_s20  }
  0x13   :  { %s186_s23 = smov [#allocation8]   ;;  %s133_s27 = scalar_lea.hbm %s249_s1, 256 }
  0x14   :  { %s35_s24 = sshll.u32 %s186_s23, 4  ;;  %p134_p8 = scmp.ne.s32.totalorder %s249_s1, %s133_s27  ;;  %s36_s24 = int_to_ptr.vmem [resolvable:$true] %s35_s24 }
  0x15   :  { %p137_p9 = scmp.lt.u32.totalorder %s133_s27, %s249_s1 }
  0x17   :  { %p139_p10 = pnand %p137_p9, %p134_p8 }
  0x19   :  { %142 = shalt.err (!%p139_p10)
}
  0x1a   :  { %s143_s4 = scalar_lea.vmem %s36_s24, 256  ;;  %p148_p12 = scmp.lt.s32.totalorder %s36_s24, %s36_s24 }
  0x1b   :  { %p144_p11 = scmp.ne.s32.totalorder %s36_s24, %s143_s4  ;;  %p149_p13 = scmp.lt.s32.totalorder %s143_s4, %s143_s4 }
  0x1d   :  { %p150_p0 = por %p149_p13, %p148_p12 }
  0x1f   :  { %p151_p1 = pnand %p150_p0, %p144_p11 }
  0x21   :  { %154 = shalt.err (!%p151_p1)
}
  0x22   :  { %41 = dma.hbm_to_vmem [thread:$0]  %s249_s1, 256, %s36_s24, [#allocation9], %s184_s19, %s184_s19, %s185_s20  }
  0x23   :  { %177 = dma.done.wait [#allocation6], 256  }
  0x24   :  { %178 = vsyncadd [#allocation6], 4294967040 }
  0x25   :  { %179 = dma.done.wait [#allocation9], 256  }
  0x26   :  { %180 = vsyncadd [#allocation9], 4294967040  ;;  %v59_v0 = vld [vmem:[#allocation5] sm:$0xff]  ;;  %v60_v1 = vld [vmem:[#allocation5 + $0x8] sm:$0xff]  ;;  %s187_s6 = smov [#allocation10]  }
  0x27   :  { %v61_v2 = vld [vmem:[#allocation8] sm:$0xff]  ;;  %v64_v3 = vadd.f32 %v60_v1, %v59_v0  ;;  %v62_v4 = vld [vmem:[#allocation8 + $0x8] sm:$0xff]  ;;  %s93_s7 = sshll.u32 %s187_s6, 4  ;;  %s94_s7 = int_to_ptr.vmem [resolvable:$true] %s93_s7 }
  0x28   :  { %v72_v5 = vmul.f32 %v61_v2, %v59_v0  ;;  %v68_v6 = vadd.f32 %v62_v4, %v61_v2  ;;  %v73_v7 = vmul.f32 %v62_v4, %v60_v1  ;;  %s155_s1 = scalar_lea.vmem %s94_s7, 384  ;;  %p160_p3 = scmp.lt.s32.totalorder %s94_s7, %s94_s7 }
  0x29   :  { %81 = vst [vmem:[#allocation10] sm:$0xff] %v64_v3  ;;  %p156_p2 = scmp.ne.s32.totalorder %s94_s7, %s155_s1  ;;  %p161_p4 = scmp.lt.s32.totalorder %s155_s1, %s155_s1 }
  0x2a   :  { %84 = vst [vmem:[#allocation10 + $0x8] sm:$0xff] %v68_v6  ;;  %v74_v8 = vadd.f32 %v73_v7, %v72_v5 }
  0x2b   :  { %p162_p5 = por %p161_p4, %p160_p3 }
  0x2c   :  { %87 = vst [vmem:[#allocation10 + $0x10] sm:$0xff] %v74_v8 }
  0x2d   :  { %p163_p6 = pnand %p162_p5, %p156_p2 }
  0x2f   :  { %166 = shalt.err (!%p163_p6)
}
  0x30   :  { %s167_s10 = scalar_lea.hbm %s250_s2, 384 }
  0x31   :  { %p168_p7 = scmp.ne.s32.totalorder %s250_s2, %s167_s10  ;;  %p171_p8 = scmp.lt.u32.totalorder %s167_s10, %s250_s2 }
  0x33   :  { %p173_p9 = pnand %p171_p8, %p168_p7 }
  0x35   :  { %176 = shalt.err (!%p173_p9)
}
  0x36   :  { %99 = dma.vmem_to_hbm [thread:$0]  %s94_s7, 384, %s250_s2, [#allocation7], %s184_s19, %s184_s19, %s185_s20  }
  0x37   :  { %181 = dma.done.wait [#allocation7], 384  }
  0x38   :  { %182 = vsyncadd [#allocation7], 4294966912 }
  0x39   :  { %103 = vsyncpa [#allocation6], 1 }
  0x3a   :  { %104 = vsyncpa [#allocation9], 1 }
  0x3b   :  { %105 = vsyncpa [#allocation7], 1 }

</bundles_post_ra>
